<compile_context>
chip_gen: v7x
topology: tpu7x:2x2x1
jax: 0.10.0
libtpu: 0.0.40
codegen_flags: <defaults>
</compile_context>

<pallas_src>
import numpy as np
import jax
import jax.numpy as jnp
from jax.experimental import pallas as pl
from jax.experimental.pallas import tpu as pltpu


# Tile targets (rows of 128 lanes).  Chosen so the double-buffered working set
# stays well under the 32 MiB default scoped VMEM on v5e/v6e and under v7x's
# 64 MiB physical VMEM:
#   spectral: 2*(2*C + C + 2) * rows * 128 * 4 B  ~ 10 MB at 1024 rows
#   spatial : 2*(2)          * rows * 128 * 4 B  ~  8 MB at 4096 rows
_SPECTRAL_TARGET_ROWS = 1024
_SPATIAL_TARGET_ROWS = 4096


# ------------------------------------------------------------------ helpers

def _round_up(x, m):
    return ((x + m - 1) // m) * m


def _pick_tile(rows, target):
    """Choose (tile_rows, padded_rows): tile_rows is a multiple of 8 dividing
    padded_rows; prefers an exact divisor of `rows` (no padding needed)."""
    if rows <= target:
        t = _round_up(rows, 8)
        return t, t
    t = (target // 8) * 8
    for cand in range(t, 7, -8):
        if rows % cand == 0:
            return cand, rows
    return t, _round_up(rows, t)


def fftfreqs(res):
    """NumPy port of sap.fftfreqs: returns (r0, ..., r_{d-1}//2+1, d) float64."""
    freqs = [np.fft.fftfreq(r, d=1.0 / r) for r in res[:-1]]
    freqs.append(np.fft.rfftfreq(res[-1], d=1.0 / res[-1]))
    omega = np.stack(np.meshgrid(*freqs, indexing="ij"), axis=-1)
    return omega.astype(np.float64)


# ------------------------------------------------------------ Pallas kernels

def _spectral_kernel(nre_ref, nim_ref, w_ref, pre_ref, pim_ref):
    """Phi = Div(N) / (Lap + 1e-6) with the denominator pre-folded into w:
         pre = sum_c nim_c * w_c ,  pim = -sum_c nre_c * w_c
    Blocks: nre/nim (1, C, Rt, 128), w (C, Rt, 128), pre/pim (1, Rt, 128)."""
    C = nre_ref.shape[1]
    pre = nim_ref[0, 0] * w_ref[0]
    pim = nre_ref[0, 0] * w_ref[0]
    for c in range(1, C):                       # unrolled VPU adds, no XLU reduce
        pre = pre + nim_ref[0, c] * w_ref[c]
        pim = pim + nre_ref[0, c] * w_ref[c]
    pre_ref[0] = pre
    pim_ref[0] = -pim


def _masked_stats_kernel(phi_ref, scr_ref, msum_ref, mcnt_ref):
    """Per-tile partials: sum(phi[screen>=0.1]) and count(screen>=0.1)."""
    phi = phi_ref[...]                                         # (Rt, 128)
    m = (scr_ref[...] >= 0.1).astype(jnp.float32)
    msum_ref[...] = jnp.sum(phi * m, axis=0, keepdims=True)    # (1, 128)
    mcnt_ref[...] = jnp.sum(m, axis=0, keepdims=True)


def _abs_sum_kernel(off_ref, phi_ref, asum_ref):
    """Per-tile partial of sum(|phi - offset|); no full-volume write."""
    d = phi_ref[...] - off_ref[0, 0]
    asum_ref[...] = jnp.sum(jnp.abs(d), axis=0, keepdims=True)


def _shift_scale_kernel(sc_ref, phi_ref, out_ref):
    """Fused final write: out = (phi - offset) * inv_scale."""
    out_ref[...] = (phi_ref[...] - sc_ref[0, 0]) * sc_ref[0, 1]


# --------------------------------------------------------- pallas_call wrappers

def spectral_phi(n_re, n_im, w_dev, tile_rows):
    B, C, RP, L = n_re.shape
    NT = RP // tile_rows
    grid_spec = pltpu.PrefetchScalarGridSpec(
        num_scalar_prefetch=0,
        # freq-tile axis outer so the shared w tile is only fetched once per tile
        grid=(NT, B),
        in_specs=[
            pl.BlockSpec((1, C, tile_rows, L), lambda t, b: (b, 0, t, 0)),
            pl.BlockSpec((1, C, tile_rows, L), lambda t, b: (b, 0, t, 0)),
            pl.BlockSpec((C, tile_rows, L), lambda t, b: (0, t, 0)),
        ],
        out_specs=[
            pl.BlockSpec((1, tile_rows, L), lambda t, b: (b, t, 0)),
            pl.BlockSpec((1, tile_rows, L), lambda t, b: (b, t, 0)),
        ],
    )
    return pl.pallas_call(
        _spectral_kernel,
        out_shape=(
            jax.ShapeDtypeStruct((B, RP, L), jnp.float32),
            jax.ShapeDtypeStruct((B, RP, L), jnp.float32),
        ),
        grid_spec=grid_spec,
        compiler_params=pltpu.CompilerParams(
            dimension_semantics=("parallel", "parallel")),
    )(n_re, n_im, w_dev)


def masked_stats(phi2, scr2, tile_rows):
    RP, L = phi2.shape
    NT = RP // tile_rows
    grid_spec = pltpu.PrefetchScalarGridSpec(
        num_scalar_prefetch=0,
        grid=(NT,),
        in_specs=[
            pl.BlockSpec((tile_rows, L), lambda t: (t, 0)),
            pl.BlockSpec((tile_rows, L), lambda t: (t, 0)),
        ],
        out_specs=[
            pl.BlockSpec((1, L), lambda t: (t, 0)),
            pl.BlockSpec((1, L), lambda t: (t, 0)),
        ],
    )
    return pl.pallas_call(
        _masked_stats_kernel,
        out_shape=(jax.ShapeDtypeStruct((NT, L), jnp.float32),
                   jax.ShapeDtypeStruct((NT, L), jnp.float32)),
        grid_spec=grid_spec,
        compiler_params=pltpu.CompilerParams(dimension_semantics=("parallel",)),
    )(phi2, scr2)


def abs_sum(phi2, offset, tile_rows):
    RP, L = phi2.shape
    NT = RP // tile_rows
    off = jnp.asarray(offset, jnp.float32).reshape(1, 1)
    grid_spec = pltpu.PrefetchScalarGridSpec(
        num_scalar_prefetch=0,
        grid=(NT,),
        in_specs=[
            pl.BlockSpec(memory_space=pltpu.MemorySpace.SMEM),
            pl.BlockSpec((tile_rows, L), lambda t: (t, 0)),
        ],
        out_specs=pl.BlockSpec((1, L), lambda t: (t, 0)),
    )
    return pl.pallas_call(
        _abs_sum_kernel,
        out_shape=jax.ShapeDtypeStruct((NT, L), jnp.float32),
        grid_spec=grid_spec,
        compiler_params=pltpu.CompilerParams(dimension_semantics=("parallel",)),
    )(off, phi2)


def shift_scale(phi2, offset, inv_scale, tile_rows):
    RP, L = phi2.shape
    NT = RP // tile_rows
    sc = jnp.stack([jnp.asarray(offset, jnp.float32),
                    jnp.asarray(inv_scale, jnp.float32)]).reshape(1, 2)
    grid_spec = pltpu.PrefetchScalarGridSpec(
        num_scalar_prefetch=0,
        grid=(NT,),
        in_specs=[
            pl.BlockSpec(memory_space=pltpu.MemorySpace.SMEM),
            pl.BlockSpec((tile_rows, L), lambda t: (t, 0)),
        ],
        out_specs=pl.BlockSpec((tile_rows, L), lambda t: (t, 0)),
    )
    return pl.pallas_call(
        _shift_scale_kernel,
        out_shape=jax.ShapeDtypeStruct((RP, L), jnp.float32),
        grid_spec=grid_spec,
        compiler_params=pltpu.CompilerParams(dimension_semantics=("parallel",)),
    )(sc, phi2)


# ------------------------------------------------------------- forward (DPSR)

def dpsr_grid_forward(ras_p, screen, res, scale=True, shift=True):
    """Pallas/JAX equivalent of DPSR_grid(res, scale, shift).forward(ras_p, screen).

    ras_p:  (B, 3, r0, r1, r2) float32   (normal rasterization)
    screen: (B, r0, r1, r2)     float32
    returns phi: (B, r0, r1, r2) float32
    """
    B, C, r0, r1, r2 = ras_p.shape
    assert (r0, r1, r2) == tuple(res) and C == len(res) == 3
    rf2 = r2 // 2 + 1
    F = r0 * r1 * rf2

    # --- spectral Poisson solve ------------------------------------------
    # TODO(synk): rfftn/irfftn have no Pallas equivalent; done with jnp.fft (XLA FFT).
    ras_s = jnp.fft.rfftn(ras_p, axes=(2, 3, 4))                 # (B, C, r0, r1, rf2) c64
    n_re = jnp.real(ras_s).reshape(B, C, F).astype(jnp.float32)
    n_im = jnp.imag(ras_s).reshape(B, C, F).astype(jnp.float32)

    # Host precompute in float64: w_c = (2*pi*omega_c) / (Lap + 1e-6), DC zeroed.
    omega = fftfreqs(res) * (2.0 * np.pi)                        # (r0, r1, rf2, 3)
    lap = -np.sum(omega ** 2, axis=-1, keepdims=True)            # (r0, r1, rf2, 1)
    w = omega / (lap + 1e-6)
    w[0, 0, 0, :] = 0.0                                          # DC bin -> 0
    w_flat = np.moveaxis(w, -1, 0).reshape(C, F).astype(np.float32)

    rows_f = -(-F // 128)
    tile_f, rows_f_pad = _pick_tile(rows_f, _SPECTRAL_TARGET_ROWS)
    F_pad = rows_f_pad * 128
    if F_pad != F:
        # zero padding is harmless: w is zero there, outputs are sliced off.
        n_re = jnp.pad(n_re, ((0, 0), (0, 0), (0, F_pad - F)))
        n_im = jnp.pad(n_im, ((0, 0), (0, 0), (0, F_pad - F)))
        w_flat = np.pad(w_flat, ((0, 0), (0, F_pad - F)))
    n_re = n_re.reshape(B, C, rows_f_pad, 128)
    n_im = n_im.reshape(B, C, rows_f_pad, 128)
    w_dev = jnp.asarray(w_flat.reshape(C, rows_f_pad, 128))

    pre, pim = spectral_phi(n_re, n_im, w_dev, tile_f)           # (B, rows_f_pad, 128)
    Phi = pre.reshape(B, F_pad)[:, :F] + 1j * pim.reshape(B, F_pad)[:, :F]
    Phi = Phi.reshape(B, r0, r1, rf2)
    phi = jnp.fft.irfftn(Phi, s=res, axes=(1, 2, 3)).astype(jnp.float32)

    if not (shift or scale):
        return phi

    # --- shift / scale: streaming, HBM-bound passes -------------------------
    V = r0 * r1 * r2
    n_elems = B * V
    rows_s = -(-n_elems // 128)
    tile_s, rows_s_pad = _pick_tile(rows_s, _SPATIAL_TARGET_ROWS)
    pad_elems = rows_s_pad * 128 - n_elems

    phi_flat = phi.reshape(n_elems)
    if pad_elems:
        phi_flat = jnp.pad(phi_flat, (0, pad_elems))             # pad with 0
    phi2 = phi_flat.reshape(rows_s_pad, 128)

    if shift:
        scr_flat = screen.reshape(n_elems)
        if pad_elems:
            scr_flat = jnp.pad(scr_flat, (0, pad_elems), constant_values=-1.0)
        scr2 = scr_flat.reshape(rows_s_pad, 128)
        msum, mcnt = masked_stats(phi2, scr2, tile_s)
        # NOTE: mcnt partials are exact in f32 (<= tile_s per lane); the final
        # sum is accurate to ~1e-7 relative even at very large B*V.
        offset = jnp.sum(msum) / jnp.sum(mcnt)
    else:
        offset = jnp.float32(0.0)

    if scale:
        asum = abs_sum(phi2, offset, tile_s)
        # padded zeros each contribute |0 - offset|; subtract them exactly.
        total_abs = jnp.sum(asum) - jnp.float32(pad_elems) * jnp.abs(offset)
        inv_scale = jnp.float32(n_elems) / total_abs             # 1 / mean(|phi - offset|)
    else:
        inv_scale = jnp.float32(1.0)

    out2 = shift_scale(phi2, offset, inv_scale, tile_s)          # single fused write
    return out2.reshape(-1)[:n_elems].reshape(B, r0, r1, r2)


# ----------------------------------------------------------- pure-JAX reference

def reference_forward(ras_p, screen, res, scale=True, shift=True):
    ras_s = jnp.fft.rfftn(ras_p, axes=(2, 3, 4))
    ras_s = jnp.transpose(ras_s, (0, 2, 3, 4, 1))                # (B, r0, r1, rf2, C)
    omega = jnp.asarray(fftfreqs(res).astype(np.float32)) * (2.0 * np.pi)
    re, im = jnp.real(ras_s), jnp.imag(ras_s)
    div_re = jnp.sum(im * omega, axis=-1)
    div_im = -jnp.sum(re * omega, axis=-1)
    lap = -jnp.sum(omega ** 2, axis=-1)
    phi_re = div_re / (lap + 1e-6)
    phi_im = div_im / (lap + 1e-6)
    phi_re = phi_re.at[:, 0, 0, 0].set(0.0)
    phi_im = phi_im.at[:, 0, 0, 0].set(0.0)
    phi = jnp.fft.irfftn(phi_re + 1j * phi_im, s=res, axes=(1, 2, 3))
    if shift:
        mask = screen >= 0.1
        offset = jnp.sum(jnp.where(mask, phi, 0.0)) / jnp.sum(mask)
        phi = phi - offset
    if scale:
        phi = phi / jnp.mean(jnp.abs(phi))
    return phi


# -------------------------------------------------------------------- main

if __name__ == "__main__":
    key = jax.random.PRNGKey(0)
    k1, k2 = jax.random.split(key)

    B = 2
    res = (16, 16, 16)
    ras_p = jax.random.normal(k1, (B, 3) + res, dtype=jnp.float32)
    screen = jax.random.uniform(k2, (B,) + res, dtype=jnp.float32)

    phi = dpsr_grid_forward(ras_p, screen, res, scale=True, shift=True)
    phi = jax.block_until_ready(phi)

    ref = reference_forward(ras_p, screen, res, scale=True, shift=True)
    ref = jax.block_until_ready(ref)

    max_err = float(jnp.max(jnp.abs(phi - ref)))
    assert phi.shape == (B,) + res
    assert max_err < 2e-3, f"mismatch vs reference: {max_err}"
    print("KERNEL_OK")
</pallas_src>

<mosaic_0001>
module attributes {stable_mosaic.version = 11 : i64} {
  func.func @_spectral_kernel(%arg0: i32, %arg1: i32, %arg2: memref<1x3x24x128xf32, #tpu.memory_space<vmem>>, %arg3: memref<1x3x24x128xf32, #tpu.memory_space<vmem>>, %arg4: memref<3x24x128xf32, #tpu.memory_space<vmem>>, %arg5: memref<1x24x128xf32, #tpu.memory_space<vmem>>, %arg6: memref<1x24x128xf32, #tpu.memory_space<vmem>>) attributes {dimension_semantics = [#tpu.dimension_semantics<parallel>, #tpu.dimension_semantics<parallel>], iteration_bounds = array<i64: 1, 2>, scalar_prefetch = 0 : i64, scratch_operands = 0 : i64, tpu.core_type = #tpu.core_type<tc>, window_params = [{transform_indices = @transform_0, window_bounds = array<i64: 1, 3, 24, 128>}, {transform_indices = @transform_1, window_bounds = array<i64: 1, 3, 24, 128>}, {transform_indices = @transform_2, window_bounds = array<i64: 3, 24, 128>}, {transform_indices = @transform_3, window_bounds = array<i64: 1, 24, 128>}, {transform_indices = @transform_4, window_bounds = array<i64: 1, 24, 128>}]} {
    %c0 = arith.constant 0 : index
    %c0_0 = arith.constant 0 : index
    %c0_1 = arith.constant 0 : index
    %c0_2 = arith.constant 0 : index
    %0 = vector.load %arg3[%c0, %c0_0, %c0_1, %c0_2] : memref<1x3x24x128xf32, #tpu.memory_space<vmem>>, vector<1x1x24x128xf32>
    %1 = vector.shape_cast %0 : vector<1x1x24x128xf32> to vector<24x128xf32>
    %c0_3 = arith.constant 0 : index
    %c0_4 = arith.constant 0 : index
    %c0_5 = arith.constant 0 : index
    %2 = vector.load %arg4[%c0_3, %c0_4, %c0_5] : memref<3x24x128xf32, #tpu.memory_space<vmem>>, vector<1x24x128xf32>
    %3 = vector.shape_cast %2 : vector<1x24x128xf32> to vector<24x128xf32>
    %4 = arith.mulf %1, %3 : vector<24x128xf32>
    %c0_6 = arith.constant 0 : index
    %c0_7 = arith.constant 0 : index
    %c0_8 = arith.constant 0 : index
    %c0_9 = arith.constant 0 : index
    %5 = vector.load %arg2[%c0_6, %c0_7, %c0_8, %c0_9] : memref<1x3x24x128xf32, #tpu.memory_space<vmem>>, vector<1x1x24x128xf32>
    %6 = vector.shape_cast %5 : vector<1x1x24x128xf32> to vector<24x128xf32>
    %c0_10 = arith.constant 0 : index
    %c0_11 = arith.constant 0 : index
    %c0_12 = arith.constant 0 : index
    %7 = vector.load %arg4[%c0_10, %c0_11, %c0_12] : memref<3x24x128xf32, #tpu.memory_space<vmem>>, vector<1x24x128xf32>
    %8 = vector.shape_cast %7 : vector<1x24x128xf32> to vector<24x128xf32>
    %9 = arith.mulf %6, %8 : vector<24x128xf32>
    %c0_13 = arith.constant 0 : index
    %c1 = arith.constant 1 : index
    %c0_14 = arith.constant 0 : index
    %c0_15 = arith.constant 0 : index
    %10 = vector.load %arg3[%c0_13, %c1, %c0_14, %c0_15] : memref<1x3x24x128xf32, #tpu.memory_space<vmem>>, vector<1x1x24x128xf32>
    %11 = vector.shape_cast %10 : vector<1x1x24x128xf32> to vector<24x128xf32>
    %c1_16 = arith.constant 1 : index
    %c0_17 = arith.constant 0 : index
    %c0_18 = arith.constant 0 : index
    %12 = vector.load %arg4[%c1_16, %c0_17, %c0_18] : memref<3x24x128xf32, #tpu.memory_space<vmem>>, vector<1x24x128xf32>
    %13 = vector.shape_cast %12 : vector<1x24x128xf32> to vector<24x128xf32>
    %14 = arith.mulf %11, %13 : vector<24x128xf32>
    %15 = arith.addf %4, %14 : vector<24x128xf32>
    %c0_19 = arith.constant 0 : index
    %c1_20 = arith.constant 1 : index
    %c0_21 = arith.constant 0 : index
    %c0_22 = arith.constant 0 : index
    %16 = vector.load %arg2[%c0_19, %c1_20, %c0_21, %c0_22] : memref<1x3x24x128xf32, #tpu.memory_space<vmem>>, vector<1x1x24x128xf32>
    %17 = vector.shape_cast %16 : vector<1x1x24x128xf32> to vector<24x128xf32>
    %c1_23 = arith.constant 1 : index
    %c0_24 = arith.constant 0 : index
    %c0_25 = arith.constant 0 : index
    %18 = vector.load %arg4[%c1_23, %c0_24, %c0_25] : memref<3x24x128xf32, #tpu.memory_space<vmem>>, vector<1x24x128xf32>
    %19 = vector.shape_cast %18 : vector<1x24x128xf32> to vector<24x128xf32>
    %20 = arith.mulf %17, %19 : vector<24x128xf32>
    %21 = arith.addf %9, %20 : vector<24x128xf32>
    %c0_26 = arith.constant 0 : index
    %c2 = arith.constant 2 : index
    %c0_27 = arith.constant 0 : index
    %c0_28 = arith.constant 0 : index
    %22 = vector.load %arg3[%c0_26, %c2, %c0_27, %c0_28] : memref<1x3x24x128xf32, #tpu.memory_space<vmem>>, vector<1x1x24x128xf32>
    %23 = vector.shape_cast %22 : vector<1x1x24x128xf32> to vector<24x128xf32>
    %c2_29 = arith.constant 2 : index
    %c0_30 = arith.constant 0 : index
    %c0_31 = arith.constant 0 : index
    %24 = vector.load %arg4[%c2_29, %c0_30, %c0_31] : memref<3x24x128xf32, #tpu.memory_space<vmem>>, vector<1x24x128xf32>
    %25 = vector.shape_cast %24 : vector<1x24x128xf32> to vector<24x128xf32>
    %26 = arith.mulf %23, %25 : vector<24x128xf32>
    %27 = arith.addf %15, %26 : vector<24x128xf32>
    %c0_32 = arith.constant 0 : index
    %c2_33 = arith.constant 2 : index
    %c0_34 = arith.constant 0 : index
    %c0_35 = arith.constant 0 : index
    %28 = vector.load %arg2[%c0_32, %c2_33, %c0_34, %c0_35] : memref<1x3x24x128xf32, #tpu.memory_space<vmem>>, vector<1x1x24x128xf32>
    %29 = vector.shape_cast %28 : vector<1x1x24x128xf32> to vector<24x128xf32>
    %c2_36 = arith.constant 2 : index
    %c0_37 = arith.constant 0 : index
    %c0_38 = arith.constant 0 : index
    %30 = vector.load %arg4[%c2_36, %c0_37, %c0_38] : memref<3x24x128xf32, #tpu.memory_space<vmem>>, vector<1x24x128xf32>
    %31 = vector.shape_cast %30 : vector<1x24x128xf32> to vector<24x128xf32>
    %32 = arith.mulf %29, %31 : vector<24x128xf32>
    %33 = arith.addf %21, %32 : vector<24x128xf32>
    %c0_39 = arith.constant 0 : index
    %c0_40 = arith.constant 0 : index
    %c0_41 = arith.constant 0 : index
    %34 = vector.load %arg5[%c0_39, %c0_40, %c0_41] : memref<1x24x128xf32, #tpu.memory_space<vmem>>, vector<1x24x128xf32>
    %35 = vector.shape_cast %34 : vector<1x24x128xf32> to vector<24x128xf32>
    %36 = vector.shape_cast %27 : vector<24x128xf32> to vector<1x24x128xf32>
    tpu.vector_store %arg5[%c0_39, %c0_40, %c0_41], %36 {strides = array<i32>} : memref<1x24x128xf32, #tpu.memory_space<vmem>>, vector<1x24x128xf32>,
    %cst = arith.constant 0.000000e+00 : f32
    %37 = vector.broadcast %cst : f32 to vector<24x128xf32>
    %38 = arith.subf %37, %33 : vector<24x128xf32>
    %c0_42 = arith.constant 0 : index
    %c0_43 = arith.constant 0 : index
    %c0_44 = arith.constant 0 : index
    %39 = vector.load %arg6[%c0_42, %c0_43, %c0_44] : memref<1x24x128xf32, #tpu.memory_space<vmem>>, vector<1x24x128xf32>
    %40 = vector.shape_cast %39 : vector<1x24x128xf32> to vector<24x128xf32>
    %41 = vector.shape_cast %38 : vector<24x128xf32> to vector<1x24x128xf32>
    tpu.vector_store %arg6[%c0_42, %c0_43, %c0_44], %41 {strides = array<i32>} : memref<1x24x128xf32, #tpu.memory_space<vmem>>, vector<1x24x128xf32>,
    return
  }
  func.func @transform_0(%arg0: i32, %arg1: i32) -> (i32, i32, i32, i32) {
    %c0_i32 = arith.constant 0 : i32
    %c0_i32_0 = arith.constant 0 : i32
    %c0_i32_1 = arith.constant 0 : i32
    return %arg1, %c0_i32, %arg0, %c0_i32_0 : i32, i32, i32, i32
  }
  func.func @transform_1(%arg0: i32, %arg1: i32) -> (i32, i32, i32, i32) {
    %c0_i32 = arith.constant 0 : i32
    %c0_i32_0 = arith.constant 0 : i32
    %c0_i32_1 = arith.constant 0 : i32
    return %arg1, %c0_i32, %arg0, %c0_i32_0 : i32, i32, i32, i32
  }
  func.func @transform_2(%arg0: i32, %arg1: i32) -> (i32, i32, i32) {
    %c0_i32 = arith.constant 0 : i32
    %c0_i32_0 = arith.constant 0 : i32
    %c0_i32_1 = arith.constant 0 : i32
    return %c0_i32, %arg0, %c0_i32_0 : i32, i32, i32
  }
  func.func @transform_3(%arg0: i32, %arg1: i32) -> (i32, i32, i32) {
    %c0_i32 = arith.constant 0 : i32
    %c0_i32_0 = arith.constant 0 : i32
    return %arg1, %arg0, %c0_i32 : i32, i32, i32
  }
  func.func @transform_4(%arg0: i32, %arg1: i32) -> (i32, i32, i32) {
    %c0_i32 = arith.constant 0 : i32
    %c0_i32_0 = arith.constant 0 : i32
    return %arg1, %arg0, %c0_i32 : i32, i32, i32
  }
}

</mosaic_0001>

<bundles_post_ra>
// kernel: tpu_custom_call.1
= control target key start
LH: loop header
LB: loop body
LE: loop exit
PB: predicated region body
PF: predicated region fallthrough
CT: control target
= control target key end

     0   :  { %s1292_s0 = inlined_call_operand.hbm [shape: f32[2,3,24,128], index: 0, kind: input, shape index: {}]   ;;  %s1293_s1 = inlined_call_operand.hbm [shape: f32[2,3,24,128], index: 1, kind: input, shape index: {}]   ;;  %s1294_s2 = inlined_call_operand.hbm [shape: f32[3,24,128], index: 2, kind: input, shape index: {}]   ;;  %s1295_s3 = inlined_call_operand.hbm [shape: f32[2,24,128], index: 3, kind: output, shape index: {0}]   ;;  %s1296_s4 = inlined_call_operand.hbm [shape: f32[2,24,128], index: 4, kind: output, shape index: {1}]  }
   0x1   :  { %1306 = sst [smem:[#allocation17_spill]] %s1292_s0 }
   0x2   :  { %1307 = sst [smem:[#allocation18_spill]] %s1294_s2 }
   0x3   :  { %10 = vsyncpa [#allocation3], 0 }
   0x4   :  { %12 = vsyncpa [#allocation3 + $0x1], 0 }
   0x5   :  { %13 = vsyncpa [#allocation6], 0 }
   0x6   :  { %15 = vsyncpa [#allocation6 + $0x1], 0 }
   0x7   :  { %16 = vsyncpa [#allocation4], 0 }
   0x8   :  { %18 = vsyncpa [#allocation4 + $0x1], 0 }
   0x9   :  { %19 = vsyncpa [#allocation10], 0 }
   0xa   :  { %21 = vsyncpa [#allocation10 + $0x1], 0  ;;  %s954_s15 = smov 0   ;;  %s956_s16 = smov 0  }
   0xb   :  { %s958_s17 = smov 0   ;;  %s960_s18 = smov 0  }
   0xc   :  { %s962_s19 = smov 0   ;;  %s964_s20 = smov 0  }
   0xd LB: > { %s985_s21 = sadd.s32 4294967295, %s918_s20   ;;  %s589_s22 = sadd.s32 4294967294, %s918_s20   ;;  %s918_s20 = sphi %s964_s20, %s27_s20   ;;  %s914_s19 = sphi %s962_s19, %s1333_s19   ;;  %s910_s18 = sphi %s960_s18, %s1332_s18   ;;  %s906_s17 = sphi %s958_s17, %s1331_s17   ;;  %s902_s16 = sphi %s956_s16, %s1330_s16   ;;  %s898_s15 = sphi %s954_s15, %s1329_s15  }
   0xe   : > { %p61_p0 = scmp.ne.s32.totalorder %s902_s16, %s898_s15  ;;  %p1297_p1 = scmp.eq.s32.totalorder %s985_s21, 0 }
   0xf   : > { %p147_p3 = scmp.eq.s32.totalorder %s589_s22, 1  ;;  %p590_p5 = scmp.ge.s32.totalorder %s918_s20, 1 }
  0x10   : > { %p994_p4 = por %p1297_p1, %p61_p0  ;;  %p182_p7 = scmp.lt.s32.totalorder %s918_s20, 3 }
  0x11   : > { %p999_p6 = por %p147_p3, %p61_p0  ;;  %s920_s26 = smov [#allocation7]  }
  0x12   : > { %s1308_s23 = scalar_select %p994_p4, 1, 0 }
  0x13   : > { %s1309_s24 = scalar_select %p999_p6, 1, 0 }
  0x14   : > { %p1004_p8 = pnand %p590_p5, %p182_p7  ;;  %s197_s27 = sshll.u32 %s920_s26, 4  ;;  %s198_s27 = int_to_ptr.vmem [resolvable:$true] %s197_s27 }
  0x15   : > { %s36_s29 = sadd.s32 1, %s914_s19  ;;  %s1312_s2 = sld [smem:[#allocation18_spill]] }
  0x16   : > { %s1310_s25 = scalar_select %p1004_p8, 1, 0 }
  0x17   : > { %p633_p9 = pneg %p1004_p8 }
  0x19   : > { %p1013_p11 = pnand %p633_p9, %p1297_p1 }
  0x1b   : > { %s708_s6 = scalar_lea.hbm %s1312_s2, 1152  ;;  %p710_p13 = pneg %p1013_p11 }
  0x1c   : > { %p709_p12 = scmp.ne.s32.totalorder %s1312_s2, %s708_s6  ;;  %p715_p5 = scmp.lt.u32.totalorder %s708_s6, %s1312_s2 }
  0x1e   : > { %p711_p0 = pnand %p710_p13, %p709_p12 }
  0x20   : > { %p712_p3 = pneg %p711_p0 }
  0x22   : > { %p717_p7 = pnand %p715_p5, %p712_p3 }
  0x24   : > { %720 = shalt.err (!%p717_p7)
}
  0x25   : > { %s721_s11 = scalar_lea.vmem %s198_s27, 1152  ;;  %p729_p2 = scmp.lt.s32.totalorder %s198_s27, %s198_s27 }
  0x26   : > { %p722_p9 = scmp.ne.s32.totalorder %s198_s27, %s721_s11  ;;  %p730_p6 = scmp.lt.s32.totalorder %s721_s11, %s721_s11 }
  0x28   : > { %p724_p10 = pnand %p722_p9, %p710_p13  ;;  %p731_p4 = por %p730_p6, %p729_p2 }
  0x2a   : > { %p725_p1 = pneg %p724_p10 }
  0x2c   : > { %p732_p8 = pnand %p731_p4, %p725_p1 }
  0x2e   : > { %735 = shalt.err (!%p732_p8)
}
  0x2f   : > { %s1301_s12 = smov 128   ;;  %s1303_s13 = smov 8  }
  0x30   : > { %636 = dma.hbm_to_vmem [thread:$0]  (!%p1013_p11), %s1312_s2, 1152, %s198_s27, [#allocation6], %s1301_s12, %s1301_s12, %s1303_s13  }
  0x31   : > { %p37_p1 = scmp.ge.s32.totalorder %s36_s29, 2  ;;  %s48_s26 = sadd.s32 1, %s906_s17 }
  0x32   : > { %p55_p2 = scmp.ne.s32.totalorder %s906_s17, %s902_s16  ;;  %p56_p4 = scmp.eq.s32.totalorder %s918_s20, 0 }
  0x33   : > { %s1335_s29 = smov (%p37_p1, %s36_s29), 0  ;;  %p1314_p8 = scmp.eq.s32.totalorder %s985_s21, 1 }
  0x34   : > { %1313 = sst [smem:[#allocation16_spill]] %s1335_s29  ;;  %p57_p6 = por %p56_p4, %p55_p2 }
  0x35   : > { %p1045_p10 = por %p1314_p8, %p55_p2  ;;  %s43_s30 = ssub.s32 %s914_s19, %s1335_s29 }
  0x36   : > { %p652_p12 = scmp.lt.s32.totalorder %s918_s20, 2  ;;  %p46_p13 = scmp.eq.s32.totalorder %s43_s30, 0 }
  0x37   : > { %s211_s5 = sand.u32 1, %s906_s17   ;;  %s1300_s7 = smul.u32 1152, %s914_s19 }
  0x38   : > { %s1053_s27 = smul.u32 72, %s211_s5  ;;  %p1060_p11 = pnand %p652_p12, %p57_p6 }
  0x39   : > { %s1056_s6 = scalar_select %p46_p13, %s906_s17, %s48_s26  }
  0x3a   : > { %s215_s8 = scalar_lea.vmem [#allocation2], %s1053_s27  ;;  %s1317_s0 = sld [smem:[#allocation17_spill]] }
  0x3b   : > { %s224_s9 = sshll.u32 %s215_s8, 4  ;;  %s1074_s30 = scalar_lea.sflag [#allocation3], %s211_s5  ;;  %s1071_s9 = int_to_ptr.vmem [resolvable:$true] %s224_s9 }
  0x3c   : > { %p738_p3 = pneg %p1060_p11 }
  0x40   : > { %s1069_s22 = scalar_lea.hbm %s1317_s0, %s1300_s7  ;;  %s741_s7 = scalar_lea.hbm %s1317_s0, 2304 }
  0x41   : > { %s736_s8 = scalar_lea.hbm %s1069_s22, 1152  ;;  %p742_p9 = scmp.lt.u32.totalorder %s1069_s22, %s1317_s0 }
  0x42   : > { %p737_p0 = scmp.ne.s32.totalorder %s1069_s22, %s736_s8  ;;  %p743_p1 = scmp.lt.u32.totalorder %s741_s7, %s736_s8 }
  0x43   : > { %p745_p4 = scmp.lt.u32.totalorder %s736_s8, %s1069_s22 }
  0x44   : > { %p739_p5 = pnand %p738_p3, %p737_p0  ;;  %p744_p2 = por %p743_p1, %p742_p9 }
  0x46   : > { %p740_p7 = pneg %p739_p5  ;;  %p746_p6 = por %p745_p4, %p744_p2 }
  0x48   : > { %p747_p8 = pnand %p746_p6, %p740_p7 }
  0x4a   : > { %750 = shalt.err (!%p747_p8)
}
  0x4b   : > { %s751_s5 = scalar_lea.vmem %s1071_s9, 1152  ;;  %s923_s11 = smov [#allocation2]  }
  0x4c   : > { %p752_p12 = scmp.ne.s32.totalorder %s1071_s9, %s751_s5  ;;  %s756_s14 = sshll.u32 %s923_s11, 4  ;;  %s757_s14 = int_to_ptr.vmem [resolvable:$false] %s756_s14 }
  0x4d   : > { %s758_s12 = scalar_lea.vmem %s757_s14, 2304  ;;  %p759_p5 = scmp.lt.s32.totalorder %s1071_s9, %s757_s14 }
  0x4e   : > { %p754_p13 = pnand %p752_p12, %p738_p3  ;;  %p760_p9 = scmp.lt.s32.totalorder %s758_s12, %s751_s5 }
  0x50   : > { %p755_p0 = pneg %p754_p13  ;;  %p761_p1 = por %p760_p9, %p759_p5 }
  0x52   : > { %p762_p2 = pnand %p761_p1, %p755_p0 }
  0x54   : > { %765 = shalt.err (!%p762_p2)
}
  0x55   : > { %s1318_s13 = smov 8   ;;  %s1319_s7 = smov 128  }
  0x56   : > { %640 = dma.hbm_to_vmem [thread:$0]  (!%p1060_p11), %s1069_s22, 1152, %s1071_s9, %s1074_s30, %s1319_s7, %s1319_s7, %s1318_s13  }
  0x57   : > { %s1320_s8 = smul.u32 1152, %s914_s19  ;;  %s238_s12 = scalar_lea.vmem [#allocation5], %s1053_s27 }
  0x58   : > { %s247_s26 = sshll.u32 %s238_s12, 4  ;;  %s1321_s0 = sand.u32 1, %s918_s20   ;;  %s1113_s26 = int_to_ptr.vmem [resolvable:$true] %s247_s26 }
  0x59   : > { %s1110_s5 = scalar_lea.hbm %s1293_s1, %s1320_s8  ;;  %s1117_s2 = scalar_lea.sflag [#allocation6], %s1321_s0 }
  0x5a   : > { %s766_s29 = scalar_lea.hbm %s1110_s5, 1152  ;;  %s771_s30 = scalar_lea.hbm %s1293_s1, 2304 }
  0x5b   : > { %p767_p7 = scmp.ne.s32.totalorder %s1110_s5, %s766_s29  ;;  %p772_p8 = scmp.lt.u32.totalorder %s1110_s5, %s1293_s1 }
  0x5c   : > { %p773_p12 = scmp.lt.u32.totalorder %s771_s30, %s766_s29  ;;  %p775_p0 = scmp.lt.u32.totalorder %s766_s29, %s1110_s5 }
  0x5d   : > { %p769_p4 = pnand %p767_p7, %p738_p3 }
  0x5e   : > { %p774_p13 = por %p773_p12, %p772_p8 }
  0x5f   : > { %p770_p6 = pneg %p769_p4 }
  0x60   : > { %p776_p5 = por %p775_p0, %p774_p13 }
  0x62   : > { %p777_p9 = pnand %p776_p5, %p770_p6 }
  0x64   : > { %780 = shalt.err (!%p777_p9)
}
  0x65   : > { %s781_s0 = scalar_lea.vmem %s1113_s26, 1152  ;;  %s924_s27 = smov [#allocation5]  }
  0x66   : > { %p782_p1 = scmp.ne.s32.totalorder %s1113_s26, %s781_s0  ;;  %s786_s14 = sshll.u32 %s924_s27, 4  ;;  %s787_s14 = int_to_ptr.vmem [resolvable:$false] %s786_s14 }
  0x67   : > { %s788_s12 = scalar_lea.vmem %s787_s14, 2304  ;;  %p789_p4 = scmp.lt.s32.totalorder %s1113_s26, %s787_s14 }
  0x68   : > { %p784_p2 = pnand %p782_p1, %p738_p3  ;;  %p790_p8 = scmp.lt.s32.totalorder %s788_s12, %s781_s0 }
  0x6a   : > { %p785_p7 = pneg %p784_p2  ;;  %p791_p12 = por %p790_p8, %p789_p4 }
  0x6c   : > { %p792_p13 = pnand %p791_p12, %p785_p7 }
  0x6e   : > { %795 = shalt.err (!%p792_p13)
}
  0x6f   : > { %643 = dma.hbm_to_vmem [thread:$0]  (!%p1060_p11), %s1110_s5, 1152, %s1113_s26, %s1117_s2, %s1319_s7, %s1319_s7, %s1318_s13  }
  0x70   : > { %p1322_p3 = scmp.ne.s32.totalorder %s1310_s25, 0 }
  0x71   : > { %s1149_s29 = sand.u32 (!%p1322_p3), 1, %s902_s16   ;;  %p1323_p6 = scmp.ne.s32.totalorder (!%p1322_p3), %s1308_s23, 0 }
  0x72   : > { %259 = sbr.rel (%p1322_p3) target bundleno = 180 (0xb4), region = 32  ;;  %s262_s22 = scalar_lea.sflag (!%p1322_p3), [#allocation3], %s1149_s29 }
  0x73   : > { %s617_s9 = smul.u32 (!%p1322_p3), 72, %s1149_s29 }
  0x75   : > { %s1153_s30 = scalar_lea.vmem (!%p1322_p3), [#allocation2], %s617_s9 }
  0x79   : > { %877 = dma.done.wait (%p1323_p6), %s262_s22, 1152  }
  0x7a   : > { %879 = vsyncadd (%p1323_p6), %s262_s22, 4294966144  ;;  %s270_s2 = sand.u32 1, %s985_s21   ;;  %s274_s10 = scalar_lea.vmem [#allocation5], %s617_s9 }
  0x7b   : > { %s271_s25 = scalar_lea.sflag [#allocation6], %s270_s2 }
  0x7c   : > { %881 = dma.done.wait (%p1323_p6), %s271_s25, 1152  }
  0x7d   : > { %883 = vsyncadd (%p1323_p6), %s271_s25, 4294966144  ;;  %p1324_p11 = scmp.eq.s32.totalorder %s985_s21, 0 }
  0x7f   : > { %885 = dma.done.wait (%p1324_p11), [#allocation6], 1152   ;;  %p1325_p0 = pmov %p1324_p11 }
  0x80   : > { %s618_s26 = smul.u32 24, %s1149_s29  ;;  %v318_v0 = vld [vmem:[%s274_s10] sm:$0xff]  ;;  %v321_v1 = vld [vmem:[#allocation7] sm:$0xff]  ;;  %v597_v2 = vld [vmem:[%s274_s10 + $0x18] sm:$0xff]  ;;  %s391_s27 = scalar_lea.sflag [#allocation4], %s1149_s29 }
  0x81   : > { %887 = vsyncadd (%p1325_p0), [#allocation6], 4294966144  ;;  %v324_v3 = vmul.f32 %v321_v1, %v318_v0  ;;  %v338_v4 = vld [vmem:[#allocation7 + $0x18] sm:$0xff]  ;;  %v603_v5 = vld [vmem:[%s274_s10 + $0x30] sm:$0xff]  ;;  %s619_s13 = smul.u32 384, %s910_s18  ;;  %s925_s12 = smov [#allocation8]  }
  0x82   : > { %v362_v6 = vld [vmem:[#allocation7 + $0x30] sm:$0xff]  ;;  %v341_v7 = vmul.f32 %v597_v2, %v338_v4  ;;  %v319_v9 = vld [vmem:[%s274_s10 + $0x8] sm:$0xff]  ;;  %v322_v10 = vld [vmem:[#allocation7 + $0x8] sm:$0xff]  ;;  %s1171_s21 = scalar_lea.vmem [#allocation8], %s618_s26  ;;  %s1197_s11 = scalar_lea.vmem [#allocation9], %s618_s26 }
  0x83   : > { %v365_v8 = vmul.f32 %v603_v5, %v362_v6  ;;  %v598_v11 = vld [vmem:[%s274_s10 + $0x20] sm:$0xff]  ;;  %v325_v12 = vmul.f32 %v322_v10, %v319_v9  ;;  %v339_v13 = vld [vmem:[#allocation7 + $0x20] sm:$0xff]  ;;  %v604_v14 = vld [vmem:[%s274_s10 + $0x38] sm:$0xff]  ;;  %s411_s23 = sshll.u32 %s1171_s21, 4  ;;  %s1193_s8 = scalar_lea.hbm %s1295_s3, %s619_s13  ;;  %s1185_s23 = int_to_ptr.vmem [resolvable:$true] %s411_s23 }
  0x84   : > { %v363_v15 = vld [vmem:[#allocation7 + $0x38] sm:$0xff]  ;;  %v344_v16 = vadd.f32 %v341_v7, %v324_v3  ;;  %v342_v17 = vmul.f32 %v598_v11, %v339_v13  ;;  %v320_v19 = vld [vmem:[%s274_s10 + $0x10] sm:$0xff]  ;;  %v323_v20 = vld [vmem:[#allocation7 + $0x10] sm:$0xff]  ;;  %s429_s0 = sshll.u32 %s1197_s11, 4  ;;  %s796_s14 = scalar_lea.vmem %s1185_s23, 384  ;;  %s1230_s0 = int_to_ptr.vmem [resolvable:$true] %s429_s0 }
  0x85   : > { %v366_v18 = vmul.f32 %v604_v14, %v363_v15  ;;  %v599_v21 = vld [vmem:[%s274_s10 + $0x28] sm:$0xff]  ;;  %v326_v22 = vmul.f32 %v323_v20, %v320_v19  ;;  %v340_v23 = vld [vmem:[#allocation7 + $0x28] sm:$0xff]  ;;  %v605_v24 = vld [vmem:[%s274_s10 + $0x40] sm:$0xff]  ;;  %p797_p5 = scmp.ne.s32.totalorder %s1185_s23, %s796_s14  ;;  %s800_s9 = sshll.u32 %s925_s12, 4  ;;  %s801_s9 = int_to_ptr.vmem [resolvable:$false] %s800_s9 }
  0x86   : > { %v364_v25 = vld [vmem:[#allocation7 + $0x40] sm:$0xff]  ;;  %v368_v26 = vadd.f32 %v365_v8, %v344_v16  ;;  %v345_v27 = vadd.f32 %v342_v17, %v325_v12  ;;  %v343_v28 = vmul.f32 %v599_v21, %v340_v23  ;;  %v606_v32 = vld [vmem:[%s1153_s30 + $0x30] sm:$0xff]  ;;  %v328_v36 = vld [vmem:[%s1153_s30 + $0x8] sm:$0xff]  ;;  %s802_s22 = scalar_lea.vmem %s801_s9, 768  ;;  %p803_p2 = scmp.lt.s32.totalorder %s1185_s23, %s801_s9 }
  0x87   : > { %v367_v29 = vmul.f32 %v605_v24, %v364_v25  ;;  %v327_v30 = vld [vmem:[%s1153_s30] sm:$0xff]  ;;  %v600_v31 = vld [vmem:[%s1153_s30 + $0x18] sm:$0xff]  ;;  %v375_v35 = vmul.f32 %v606_v32, %v362_v6  ;;  %v331_v41 = vmul.f32 %v328_v36, %v322_v10  ;;  %v329_v43 = vld [vmem:[%s1153_s30 + $0x10] sm:$0xff]  ;;  %p798_p9 = pnand %p797_p5, %p1045_p10  ;;  %p804_p7 = scmp.lt.s32.totalorder %s802_s22, %s796_s14 }
  0x88   : > { %v330_v33 = vmul.f32 %v327_v30, %v321_v1  ;;  %v351_v34 = vmul.f32 %v600_v31, %v338_v4  ;;  %v601_v37 = vld [vmem:[%s1153_s30 + $0x20] sm:$0xff]  ;;  %v607_v38 = vld [vmem:[%s1153_s30 + $0x38] sm:$0xff]  ;;  %381 = vst [vmem:[%s1171_s21] sm:$0xff] %v368_v26  ;;  %v369_v39 = vadd.f32 %v366_v18, %v345_v27  ;;  %v346_v40 = vadd.f32 %v343_v28, %v326_v22  ;;  %v602_v44 = vld [vmem:[%s1153_s30 + $0x28] sm:$0xff] }
  0x89   : > { %v352_v42 = vmul.f32 %v601_v37, %v339_v13  ;;  %v608_v45 = vld [vmem:[%s1153_s30 + $0x40] sm:$0xff]  ;;  %v376_v47 = vmul.f32 %v607_v38, %v363_v15  ;;  %v332_v48 = vmul.f32 %v329_v43, %v323_v20  ;;  %v353_v49 = vmul.f32 %v602_v44, %v340_v23  ;;  %p799_p1 = pneg %p798_p9  ;;  %p805_p4 = por %p804_p7, %p803_p2 }
  0x8a   : > { %v354_v46 = vadd.f32 %v351_v34, %v330_v33  ;;  %382 = vst [vmem:[%s1171_s21 + $0x8] sm:$0xff] %v369_v39  ;;  %v370_v50 = vadd.f32 %v367_v29, %v346_v40  ;;  %v377_v52 = vmul.f32 %v608_v45, %v364_v25 }
  0x8b   : > { %v355_v51 = vadd.f32 %v352_v42, %v331_v41  ;;  %v356_v54 = vadd.f32 %v353_v49, %v332_v48  ;;  %p806_p8 = pnand %p805_p4, %p799_p1 }
  0x8c   : > { %v378_v53 = vadd.f32 %v375_v35, %v354_v46  ;;  %383 = vst [vmem:[%s1171_s21 + $0x10] sm:$0xff] %v370_v50 }
  0x8d   : > { %v379_v55 = vadd.f32 %v376_v47, %v355_v51  ;;  %v380_v57 = vadd.f32 %v377_v52, %v356_v54 }
  0x8e   : > { %v384_v56 = vsub.f32 0.0, %v378_v53 }
  0x8f   : > { %809 = shalt.err (!%p806_p8)
}
  0x90   : > { %s810_s30 = scalar_lea.hbm %s1193_s8, 384  ;;  %s814_s10 = scalar_lea.hbm %s1295_s3, 768 }
  0x91   : > { %p811_p12 = scmp.ne.s32.totalorder %s1193_s8, %s810_s30  ;;  %p815_p6 = scmp.lt.u32.totalorder %s1193_s8, %s1295_s3 }
  0x92   : > { %p816_p11 = scmp.lt.u32.totalorder %s814_s10, %s810_s30  ;;  %p818_p5 = scmp.lt.u32.totalorder %s810_s30, %s1193_s8 }
  0x93   : > { %p812_p13 = pnand %p811_p12, %p1045_p10 }
  0x94   : > { %p817_p0 = por %p816_p11, %p815_p6 }
  0x95   : > { %p813_p3 = pneg %p812_p13 }
  0x96   : > { %p819_p9 = por %p818_p5, %p817_p0 }
  0x98   : > { %p820_p1 = pnand %p819_p9, %p813_p3 }
  0x9a   : > { %823 = shalt.err (!%p820_p1)
}
  0x9b   : > { %s926_s7 = smov 128   ;;  %s927_s5 = smov 8   ;;  %v385_v58 = vsub.f32 0.0, %v379_v55  ;;  %387 = vst [vmem:[%s1197_s11] sm:$0xff] %v384_v56  ;;  %v386_v59 = vsub.f32 0.0, %v380_v57 }
  0x9c   : > { %629 = dma.vmem_to_hbm [thread:$0]  (%p1045_p10), %s1185_s23, 384, %s1193_s8, %s391_s27, %s926_s7, %s926_s7, %s927_s5  }
  0x9d   : > { %s1238_s9 = scalar_lea.hbm %s1296_s4, %s619_s13  ;;  %388 = vst [vmem:[%s1197_s11 + $0x8] sm:$0xff] %v385_v58  ;;  %389 = vst [vmem:[%s1197_s11 + $0x10] sm:$0xff] %v386_v59  ;;  %s396_s22 = scalar_lea.sflag [#allocation10], %s1149_s29 }
  0x9e   : > { %s824_s30 = scalar_lea.vmem %s1230_s0, 384  ;;  %s928_s23 = smov [#allocation9]  }
  0x9f   : > { %p825_p2 = scmp.ne.s32.totalorder %s1230_s0, %s824_s30  ;;  %s828_s8 = sshll.u32 %s928_s23, 4  ;;  %s829_s8 = int_to_ptr.vmem [resolvable:$false] %s828_s8 }
  0xa0   : > { %s830_s27 = scalar_lea.vmem %s829_s8, 768  ;;  %p831_p8 = scmp.lt.s32.totalorder %s1230_s0, %s829_s8 }
  0xa1   : > { %p826_p7 = pnand %p825_p2, %p1045_p10  ;;  %p832_p12 = scmp.lt.s32.totalorder %s830_s27, %s824_s30 }
  0xa3   : > { %p827_p4 = pneg %p826_p7  ;;  %p833_p13 = por %p832_p12, %p831_p8 }
  0xa5   : > { %p834_p3 = pnand %p833_p13, %p827_p4 }
  0xa7   : > { %837 = shalt.err (!%p834_p3)
}
  0xa8   : > { %s838_s18 = scalar_lea.hbm %s1238_s9, 384  ;;  %s842_s2 = scalar_lea.hbm %s1296_s4, 768 }
  0xa9   : > { %p839_p6 = scmp.ne.s32.totalorder %s1238_s9, %s838_s18  ;;  %p843_p5 = scmp.lt.u32.totalorder %s1238_s9, %s1296_s4 }
  0xaa   : > { %p844_p9 = scmp.lt.u32.totalorder %s842_s2, %s838_s18  ;;  %p846_p2 = scmp.lt.u32.totalorder %s838_s18, %s1238_s9 }
  0xab   : > { %p840_p11 = pnand %p839_p6, %p1045_p10 }
  0xac   : > { %p845_p1 = por %p844_p9, %p843_p5 }
  0xad   : > { %p841_p0 = pneg %p840_p11 }
  0xae   : > { %p847_p7 = por %p846_p2, %p845_p1 }
  0xb0   : > { %p848_p4 = pnand %p847_p7, %p841_p0 }
  0xb2   : > { %851 = shalt.err (!%p848_p4)
}
  0xb3   : > { %630 = dma.vmem_to_hbm [thread:$0]  (%p1045_p10), %s1230_s0, 384, %s1238_s9, %s396_s22, %s926_s7, %s926_s7, %s927_s5  }
  0xb4 PF: > { %s444_s26 = sand.u32 1, %s898_s15   ;;  %p1326_p8 = scmp.ne.s32.totalorder %s1309_s24, 0 }
  0xb5   : > { %p1327_p12 = scmp.ge.s32.totalorder %s918_s20, 2  ;;  %s445_s21 = scalar_lea.sflag [#allocation4], %s444_s26 }
  0xb7   : > { %p645_p13 = pnand %p1327_p12, %p1326_p8 }
  0xb9   : > { %889 = dma.done.wait (!%p645_p13), %s445_s21, 384  }
  0xba   : > { %891 = vsyncadd (!%p645_p13), %s445_s21, 4294966912  ;;  %s454_s28 = scalar_lea.sflag [#allocation10], %s444_s26 }
  0xbb   : > { %893 = dma.done.wait (!%p645_p13), %s454_s28, 384  }
  0xbc   : > { %895 = vsyncadd (!%p645_p13), %s454_s28, 4294966912  ;;  %s27_s20 = sadd.s32 1, %s918_s20   ;;  %s1328_s29 = sld [smem:[#allocation16_spill]] }
  0xbd   : > { %p24_p3 = scmp.ge.s32.totalorder %s27_s20, 4   ;;  %s1329_s15 = smov %s902_s16 }
  0xbe   : > { %s1330_s16 = smov %s906_s17  ;;  %s1331_s17 = smov %s1056_s6 }
  0xbf   : > { %s1332_s18 = smov %s914_s19  ;;  %26 = sbr.rel (!%p24_p3) target bundleno = 13 (0xd), region = 118 }
  0xc2   : > { %s1333_s19 = smov %s1328_s29 }
  0xc6   :  { %459 = vsyncpa [#allocation3], 1 }
  0xc7   :  { %461 = vsyncpa [#allocation3 + $0x1], 1 }
  0xc8   :  { %462 = vsyncpa [#allocation6], 1 }
  0xc9   :  { %464 = vsyncpa [#allocation6 + $0x1], 1 }
  0xca   :  { %465 = vsyncpa [#allocation4], 1 }
  0xcb   :  { %467 = vsyncpa [#allocation4 + $0x1], 1 }
  0xcc   :  { %468 = vsyncpa [#allocation10], 1 }
  0xcd   :  { %470 = vsyncpa [#allocation10 + $0x1], 1 }

</bundles_post_ra>
